<compile_context>
chip_gen: v5e
topology: v5e:2x2
jax: 0.10.0
libtpu: 0.0.40
codegen_flags: <defaults>
</compile_context>

<pallas_src>
import functools

import jax
import jax.numpy as jnp
from jax.experimental import pallas as pl
from jax.experimental.pallas import tpu as pltpu

EPS = 1e-7


def _nsl_kernel(cur_ref, oth_ref, loss_ref, *, n_pos, n_valid, inv_np, inv_nk):
    step = pl.program_id(0)

    @pl.when(step == 0)
    def _():
        loss_ref[0, 0] = jnp.float32(0.0)

    cur = cur_ref[...].astype(jnp.float32)          # (tR, H)
    oth = oth_ref[...].astype(jnp.float32)          # (tR, H)

    # Per-row dot product over H: VPU multiply + XLU lane reduction.
    # (Intentionally NOT an MXU matmul -- H is tiny.)
    score = jnp.sum(cur * oth, axis=-1, keepdims=True)          # (tR, 1)

    t_rows = cur.shape[0]
    row = step * t_rows + jax.lax.broadcasted_iota(jnp.int32, (t_rows, 1), 0)
    is_pos = row < n_pos
    is_valid = row < n_valid

    sign = jnp.where(is_pos, 1.0, -1.0).astype(jnp.float32)
    # Per-row weight folds the two means: 1/(B*P) for pos rows, 1/(B*K) for
    # neg rows, 0 for padding rows appended by the wrapper.
    weight = jnp.where(
        is_pos, inv_np, jnp.where(is_valid, inv_nk, 0.0)
    ).astype(jnp.float32)

    # Keep log(sigmoid(x) + EPS) exactly as the reference for bit parity.
    log_term = jnp.log(jax.nn.sigmoid(sign * score) + EPS)

    loss_ref[0, 0] += -jnp.sum(weight * log_term)


def negative_sampling_loss(cur_embs, pos_embs, neg_embs, *, tile_rows=512):
    """cur_embs: (B, H); pos_embs: (B, P, H) or (B, H); neg_embs: (B, K, H)."""
    B, H = cur_embs.shape
    pos = pos_embs.reshape(B, -1, H)
    neg = neg_embs.reshape(B, -1, H)
    P = pos.shape[1]
    K = neg.shape[1]

    n_pos = B * P
    n_neg = B * K
    n_rows = n_pos + n_neg

    # Fused, sublane-dense 2D layout: [pos rows ; neg rows], each (rows, H),
    # with `cur` repeated to match row-for-row (b-major, pair-minor order).
    other = jnp.concatenate(
        [pos.reshape(n_pos, H), neg.reshape(n_neg, H)], axis=0)
    cur_rows = jnp.concatenate(
        [jnp.repeat(cur_embs, P, axis=0), jnp.repeat(cur_embs, K, axis=0)], axis=0)

    # Row tile: multiple of 8 sublanes, capped at the (8-rounded) row count.
    # v7x note: 2 inputs x 2 buffers x tile_rows x H x 4B must stay well under
    # the scoped-VMEM limit (64 MiB physical) -- the 512-row default is tiny.
    rows8 = ((n_rows + 7) // 8) * 8
    tile_rows = max(8, min((int(tile_rows) // 8) * 8, rows8))
    padded_rows = pl.cdiv(n_rows, tile_rows) * tile_rows
    if padded_rows != n_rows:
        pad = padded_rows - n_rows
        other = jnp.pad(other, ((0, pad), (0, 0)))
        cur_rows = jnp.pad(cur_rows, ((0, pad), (0, 0)))

    grid = (padded_rows // tile_rows,)

    kernel = functools.partial(
        _nsl_kernel,
        n_pos=n_pos,
        n_valid=n_rows,
        inv_np=1.0 / n_pos,
        inv_nk=1.0 / n_neg,
    )

    out = pl.pallas_call(
        kernel,
        out_shape=jax.ShapeDtypeStruct((1, 1), jnp.float32),
        grid=grid,
        in_specs=[
            pl.BlockSpec((tile_rows, H), lambda i: (i, 0)),
            pl.BlockSpec((tile_rows, H), lambda i: (i, 0)),
        ],
        # Scalar loss accumulates in SMEM (avoids a 1-lane masked VMEM store
        # plus full-tile writeback for 4 bytes).
        out_specs=pl.BlockSpec(memory_space=pltpu.MemorySpace.SMEM),
        compiler_params=pltpu.CompilerParams(
            # Accumulator output => the row-tile axis must stay "arbitrary".
            # TODO(synk): on v7x, split rows "parallel" across the two
            # TensorCores with per-core partial sums combined in an epilogue.
            dimension_semantics=("arbitrary",),
        ),
    )(cur_rows, other)
    return out[0, 0]


def _reference(cur_embs, pos_embs, neg_embs):
    B, H = cur_embs.shape
    cur = cur_embs.reshape(B, 1, H).astype(jnp.float32)
    pos = pos_embs.reshape(B, -1, H).astype(jnp.float32)
    neg = neg_embs.reshape(B, -1, H).astype(jnp.float32)
    pos_score = jnp.sum(cur * pos, axis=-1)
    neg_score = jnp.sum(cur * neg, axis=-1)
    pos_loss = -jnp.mean(jnp.log(jax.nn.sigmoid(pos_score) + EPS))
    neg_loss = -jnp.mean(jnp.log(jax.nn.sigmoid(-neg_score) + EPS))
    return pos_loss + neg_loss


if __name__ == "__main__":
    key = jax.random.PRNGKey(0)
    k1, k2, k3 = jax.random.split(key, 3)

    B, H, P, K = 8, 32, 1, 5  # small node2vec-style shapes
    cur_embs = jax.random.normal(k1, (B, H), dtype=jnp.float32)
    pos_embs = jax.random.normal(k2, (B, P, H), dtype=jnp.float32)
    neg_embs = jax.random.normal(k3, (B, K, H), dtype=jnp.float32)

    ref = _reference(cur_embs, pos_embs, neg_embs)

    # Multi-step grid (exercises the SMEM accumulator across 3 row tiles).
    loss_tiled = negative_sampling_loss(cur_embs, pos_embs, neg_embs, tile_rows=16)
    jax.block_until_ready(loss_tiled)
    assert jnp.allclose(loss_tiled, ref, atol=1e-5, rtol=1e-5), (loss_tiled, ref)

    # Single-step grid (default tile covers all rows in one block).
    loss_single = negative_sampling_loss(cur_embs, pos_embs, neg_embs)
    jax.block_until_ready(loss_single)
    assert jnp.allclose(loss_single, ref, atol=1e-5, rtol=1e-5), (loss_single, ref)

    print("KERNEL_OK")
</pallas_src>

<mosaic_0001>
module attributes {stable_mosaic.version = 11 : i64} {
  func.func @_nsl_kernel(%arg0: i32, %arg1: memref<16x32xf32, #tpu.memory_space<vmem>>, %arg2: memref<16x32xf32, #tpu.memory_space<vmem>>, %arg3: memref<1x1xf32, #tpu.memory_space<smem>>) attributes {dimension_semantics = [#tpu.dimension_semantics<arbitrary>], iteration_bounds = array<i64: 3>, scalar_prefetch = 0 : i64, scratch_operands = 0 : i64, tpu.core_type = #tpu.core_type<tc>, window_params = [{transform_indices = @transform_0, window_bounds = array<i64: 16, 32>}, {transform_indices = @transform_1, window_bounds = array<i64: 16, 32>}, {transform_indices = @transform_2, window_bounds = array<i64: 1, 1>}]} {
    %c0_i32 = arith.constant 0 : i32
    %0 = arith.cmpi eq, %arg0, %c0_i32 : i32
    %1 = arith.extui %0 : i1 to i32
    %c0_i32_0 = arith.constant 0 : i32
    %2 = arith.cmpi ne, %1, %c0_i32_0 : i32
    scf.if %2 {
      %cst_17 = arith.constant 0.000000e+00 : f32
      %c0_18 = arith.constant 0 : index
      %c0_19 = arith.constant 0 : index
      %42 = memref.load %arg3[%c0_18, %c0_19] : memref<1x1xf32, #tpu.memory_space<smem>>
      memref.store %cst_17, %arg3[%c0_18, %c0_19] : memref<1x1xf32, #tpu.memory_space<smem>>
    } else {
    }
    %c0 = arith.constant 0 : index
    %c0_1 = arith.constant 0 : index
    %3 = vector.load %arg1[%c0, %c0_1] : memref<16x32xf32, #tpu.memory_space<vmem>>, vector<16x32xf32>
    %c0_2 = arith.constant 0 : index
    %c0_3 = arith.constant 0 : index
    %4 = vector.load %arg2[%c0_2, %c0_3] : memref<16x32xf32, #tpu.memory_space<vmem>>, vector<16x32xf32>
    %5 = arith.mulf %3, %4 : vector<16x32xf32>
    %cst = arith.constant dense<0.000000e+00> : vector<16xf32>
    %6 = vector.multi_reduction <add>, %5, %cst [1] : vector<16x32xf32> to vector<16xf32>
    %7 = vector.shape_cast %6 : vector<16xf32> to vector<16x1xf32>
    %c16_i32 = arith.constant 16 : i32
    %8 = arith.muli %arg0, %c16_i32 : i32
    %9 = tpu.iota {dimensions = array<i32: 0>} : vector<16x1xi32>
    %10 = vector.broadcast %8 : i32 to vector<16x1xi32>
    %11 = arith.addi %10, %9 : vector<16x1xi32>
    %c8_i32 = arith.constant 8 : i32
    %12 = vector.broadcast %c8_i32 : i32 to vector<16x1xi32>
    %13 = arith.cmpi slt, %11, %12 : vector<16x1xi32>
    %c48_i32 = arith.constant 48 : i32
    %14 = vector.broadcast %c48_i32 : i32 to vector<16x1xi32>
    %15 = arith.cmpi slt, %11, %14 : vector<16x1xi32>
    %cst_4 = arith.constant 1.000000e+00 : f32
    %cst_5 = arith.constant -1.000000e+00 : f32
    %16 = vector.broadcast %cst_4 : f32 to vector<16x1xf32>
    %17 = vector.broadcast %cst_5 : f32 to vector<16x1xf32>
    %18 = arith.select %13, %16, %17 : vector<16x1xi1>, vector<16x1xf32>
    %cst_6 = arith.constant 2.500000e-02 : f32
    %cst_7 = arith.constant 0.000000e+00 : f32
    %19 = vector.broadcast %cst_6 : f32 to vector<16x1xf32>
    %20 = vector.broadcast %cst_7 : f32 to vector<16x1xf32>
    %21 = arith.select %15, %19, %20 : vector<16x1xi1>, vector<16x1xf32>
    %cst_8 = arith.constant 1.250000e-01 : f32
    %22 = vector.broadcast %cst_8 : f32 to vector<16x1xf32>
    %23 = arith.select %13, %22, %21 : vector<16x1xi1>, vector<16x1xf32>
    %24 = arith.mulf %18, %7 : vector<16x1xf32>
    %25 = arith.negf %24 : vector<16x1xf32>
    %26 = math.exp %25 : vector<16x1xf32>
    %cst_9 = arith.constant 1.000000e+00 : f32
    %27 = vector.broadcast %cst_9 : f32 to vector<16x1xf32>
    %28 = arith.addf %27, %26 : vector<16x1xf32>
    %29 = arith.divf %27, %28 : vector<16x1xf32>
    %cst_10 = arith.constant 1.000000e-07 : f32
    %30 = vector.broadcast %cst_10 : f32 to vector<16x1xf32>
    %31 = arith.addf %29, %30 : vector<16x1xf32>
    %32 = math.log %31 : vector<16x1xf32>
    %c0_11 = arith.constant 0 : index
    %c0_12 = arith.constant 0 : index
    %33 = memref.load %arg3[%c0_11, %c0_12] : memref<1x1xf32, #tpu.memory_space<smem>>
    %34 = arith.mulf %23, %32 : vector<16x1xf32>
    %35 = vector.shape_cast %34 : vector<16x1xf32> to vector<1x16x1xf32>
    %cst_13 = arith.constant dense<0.000000e+00> : vector<1xf32>
    %36 = vector.multi_reduction <add>, %35, %cst_13 [1, 2] : vector<1x16x1xf32> to vector<1xf32>
    %37 = vector.shape_cast %36 : vector<1xf32> to vector<1x1x1xf32>
    %38 = vector.extract %37[0, 0, 0] : f32 from vector<1x1x1xf32>
    %cst_14 = arith.constant 0.000000e+00 : f32
    %39 = arith.subf %cst_14, %38 : f32
    %40 = arith.addf %33, %39 : f32
    %c0_15 = arith.constant 0 : index
    %c0_16 = arith.constant 0 : index
    %41 = memref.load %arg3[%c0_15, %c0_16] : memref<1x1xf32, #tpu.memory_space<smem>>
    memref.store %40, %arg3[%c0_15, %c0_16] : memref<1x1xf32, #tpu.memory_space<smem>>
    return
  }
  func.func @transform_0(%arg0: i32) -> (i32, i32) {
    %c0_i32 = arith.constant 0 : i32
    %c0_i32_0 = arith.constant 0 : i32
    return %arg0, %c0_i32 : i32, i32
  }
  func.func @transform_1(%arg0: i32) -> (i32, i32) {
    %c0_i32 = arith.constant 0 : i32
    %c0_i32_0 = arith.constant 0 : i32
    return %arg0, %c0_i32 : i32, i32
  }
  func.func @transform_2(%arg0: i32) -> (i32, i32) {
    %c0_i32 = arith.constant 0 : i32
    %c0_i32_0 = arith.constant 0 : i32
    %c0_i32_1 = arith.constant 0 : i32
    return %c0_i32, %c0_i32_0 : i32, i32
  }
}

</mosaic_0001>

<bundles_post_ra>
// kernel: tpu_custom_call.1
= control target key start
LH: loop header
LB: loop body
LE: loop exit
PB: predicated region body
PF: predicated region fallthrough
CT: control target
= control target key end

     0   :  { %7 = vsyncpa [#allocation3], 0  ;;  %s411_s9 = smov 0   ;;  %s441_s0 = inlined_call_operand.vmem [shape: f32[48,32], index: 0, kind: input, shape index: {}]   ;;  %s442_s1 = inlined_call_operand.vmem [shape: f32[48,32], index: 1, kind: input, shape index: {}]   ;;  %s443_s2 = inlined_call_operand.hbm [shape: f32[1,1], index: 2, kind: output, shape index: {}]  }
   0x1 LB: > { %s417_s10 = sadd.s32 4294967295, %s390_s9   ;;  %p318_p0 = scmp.ge.s32.totalorder %s390_s9, 1  ;;  %s390_s9 = sphi %s411_s9, %s13_s9  }
   0x2   : > { %p120_p1 = scmp.lt.s32.totalorder %s390_s9, 4 }
   0x4   : > { %p121_p2 = pnand %p318_p0, %p120_p1 }
   0x5   : > { %s319_s11 = sshll.u32 (!%p121_p2), %s417_s10, 1  ;;  %s324_s19 = sshll.u32 (!%p121_p2), %s417_s10, 4 }
   0x6   : > { %124 = sbr.rel (%p121_p2) target bundleno = 376 (0x178), region = 28  ;;  %p143_p3 = scmp.lt.s32.totalorder (!%p121_p2), %s319_s11, 5 }
   0x7   : > { %p339_p4 = scmp.eq.s32.totalorder (!%p121_p2), %s417_s10, 0  ;;  %s394_s20 = smov (!%p121_p2), 0.0  }
   0x8   : > { %s262_s24 = sshll.u32 (!%p121_p2), %s443_s2, 4  ;;  %p340_p5 = scmp.eq.s32.totalorder (!%p121_p2), %s417_s10, 2  ;;  %s263_s24 = int_to_ptr.hbm [resolvable:$true] %s262_s24 }
   0x9   : > { %s395_s28 = smov (!%p121_p2), [#allocation2]  }
   0xb   : > { %s445_s11 = smov (!%p143_p3, %s319_s11), 5  ;;  %vm166_vm0 = vcmask 261120   ;;  %v174_v8 = vlaneseq  ;;  %v177_v10 = vstv %s324_s19  ;;  %v392_v13 = vmov -1.0   ;;  %334 = sst [smem:[#allocation2]] (%p339_p4), %s394_s20 }
   0xc   : > { %s320_s12 = sshll.u32 %s445_s11, 3  ;;  %v393_v50 = vmov 0.0   ;;  %vm239_vm13 = vcmask 7168   ;;  %s236_s21 = sld [smem:[#allocation2]] }
   0xd   : > { %s146_s15 = scalar_lea.vmem %s441_s0, %s320_s12  ;;  %s152_s18 = scalar_lea.vmem %s442_s1, %s320_s12  ;;  %v175_v9 = vshrl.u32 %v174_v8, 7 }
   0xe   : > { %v160_v0 = vld [vmem:[%s146_s15] sm:$0xff]  ;;  %v161_v3 = vld [vmem:[%s146_s15 + $0x8] sm:$0xff] }
   0xf   : > { %v162_v1 = vld [vmem:[%s152_s18] sm:$0xff]  ;;  %v163_v4 = vld [vmem:[%s152_s18 + $0x8] sm:$0xff]  ;;  %v178_v11 = vadd.s32 %v177_v10, %v175_v9  ;;  %v176_v12 = vadd.s32 8, %v175_v9 }
  0x10   : > { %v164_v2 = vmul.f32 %v162_v1, %v160_v0  ;;  %v165_v6 = vmul.f32 %v163_v4, %v161_v3 }
  0x11   : > { %vm180_vm1 = vcmp.lt.s32.totalorder %v178_v11, 8  ;;  %v179_v15 = vadd.s32 %v177_v10, %v176_v12  ;;  %vm182_vm11 = vcmp.lt.s32.totalorder %v178_v11, 48 }
  0x12   : > { %v167_v5 = vsel %vm166_vm0, %v164_v2, 0.0  ;;  %v170_v7 = vsel %vm166_vm0, %v165_v6, 0.0  ;;  %v184_v14 = vsel %vm180_vm1, 1.0, %v392_v13  ;;  %v186_v51 = vsel %vm182_vm11, 0.025, %v393_v50 }
  0x13   : > { %168 = vadd.xlane.f32.xlu0 %v167_v5  ;;  %vm181_vm2 = vcmp.lt.s32.totalorder %v179_v15, 8  ;;  %vm183_vm12 = vcmp.lt.s32.totalorder %v179_v15, 48  ;;  %v188_v54 = vsel %vm180_vm1, 0.125, %v186_v51 }
  0x14   : > { %v185_v19 = vsel %vm181_vm2, 1.0, %v392_v13  ;;  %v187_v52 = vsel %vm183_vm12, 0.025, %v393_v50 }
  0x15   : > { %v189_v56 = vsel %vm181_vm2, 0.125, %v187_v52 }
  0x1b   : > { %171 = vadd.xlane.f32.xlu0 %v170_v7 }
  0x86   : > { %v169_v16 = vpop.xlane.xlu0 %168 }
  0x87   : > { %v190_v17 = vmul.f32 %v184_v14, %v169_v16 }
  0x89   : > { %v325_v18 = vmul.f32 -1.442695, %v190_v17 }
  0x8b   : > { %354 = vpow2.f32 %v325_v18 }
  0x8e   : > { %v172_v20 = vpop.xlane.xlu0 %171 }
  0x8f   : > { %v191_v21 = vmul.f32 %v185_v19, %v172_v20 }
  0x91   : > { %v355_v22 = vpop.eup %354  ;;  %v326_v23 = vmul.f32 -1.442695, %v191_v21 }
  0x92   : > { %v198_v24 = vadd.f32 1.0, %v355_v22 }
  0x93   : > { %356 = vpow2.f32 %v326_v23 }
  0x94   : > { %358 = vrcp.f32 %v198_v24  ;;  %v211_v30 = vand.u32 2147483648, %v198_v24  ;;  %v209_v32 = vand.u32 2147483647, %v198_v24  ;;  %vm205_vm4 = vweird.f32 %v198_v24 }
  0x96   : > { %v212_v35 = vor.u32 1.1754944e-38, %v211_v30  ;;  %vm210_vm6 = vcmp.eq.f32.partialorder %v209_v32, 8.507059e+37 }
  0x99   : > { %v357_v25 = vpop.eup %356 }
  0x9a   : > { %v359_v26 = vpop.eup %358  ;;  %v199_v27 = vadd.f32 1.0, %v357_v25 }
  0x9b   : > { %v201_v28 = vmul.f32 %v359_v26, %v198_v24  ;;  %vm206_vm3 = vweird.f32 %v359_v26 }
  0x9c   : > { %360 = vrcp.f32 %v199_v27  ;;  %vm207_vm5 = vmor %vm205_vm4, %vm206_vm3  ;;  %v226_v41 = vand.u32 2147483648, %v199_v27  ;;  %v224_v43 = vand.u32 2147483647, %v199_v27  ;;  %vm220_vm8 = vweird.f32 %v199_v27 }
  0x9d   : > { %v202_v29 = vsub.f32 1.0, %v201_v28 }
  0x9e   : > { %v227_v45 = vor.u32 1.1754944e-38, %v226_v41  ;;  %vm225_vm10 = vcmp.eq.f32.partialorder %v224_v43, 8.507059e+37 }
  0x9f   : > { %v203_v31 = vmul.f32 %v359_v26, %v202_v29 }
  0xa1   : > { %v204_v33 = vadd.f32 %v359_v26, %v203_v31 }
  0xa2   : > { %v361_v34 = vpop.eup %360 }
  0xa3   : > { %v216_v36 = vmul.f32 %v361_v34, %v199_v27  ;;  %v208_v37 = vsel %vm207_vm5, %v359_v26, %v204_v33  ;;  %vm221_vm7 = vweird.f32 %v361_v34 }
  0xa4   : > { %v213_v38 = vsel %vm210_vm6, %v212_v35, %v208_v37  ;;  %vm222_vm9 = vmor %vm220_vm8, %vm221_vm7 }
  0xa5   : > { %v217_v39 = vsub.f32 1.0, %v216_v36  ;;  %v230_v40 = vadd.f32 1e-07, %v213_v38 }
  0xa7   : > { %v218_v42 = vmul.f32 %v361_v34, %v217_v39  ;;  %362 = vlog2.f32 %v230_v40 }
  0xa9   : > { %v219_v44 = vadd.f32 %v361_v34, %v218_v42 }
  0xab   : > { %v223_v46 = vsel %vm222_vm9, %v361_v34, %v219_v44 }
  0xac   : > { %v228_v47 = vsel %vm225_vm10, %v227_v45, %v223_v46 }
  0xad   : > { %v231_v48 = vadd.f32 1e-07, %v228_v47  ;;  %v363_v49 = vpop.eup %362 }
  0xae   : > { %v233_v53 = vmul.f32 0.6931472, %v363_v49 }
  0xaf   : > { %364 = vlog2.f32 %v231_v48 }
  0xb0   : > { %v237_v58 = vmul.f32 %v233_v53, %v188_v54 }
  0xb2   : > { %v240_v60 = vsel %vm239_vm13, %v237_v58, 0.0 }
  0xb5   : > { %v365_v55 = vpop.eup %364 }
  0xb6   : > { %v235_v57 = vmul.f32 0.6931472, %v365_v55 }
  0xb8   : > { %v238_v59 = vmul.f32 %v235_v57, %v189_v56 }
  0xba   : > { %v241_v61 = vsel %vm239_vm13, %v238_v59, 0.0 }
  0xbb   : > { %v242_v62 = vadd.f32 %v241_v61, %v240_v60 }
  0xbd   : > { %243 = vadd.xlane.f32.xlu1 %v242_v62 }
 0x130   : > { %v244_v63 = vpop.xlane.xlu1 %243 }
 0x131   : > { %v245_v0 = vrot.slane %v244_v63, 4 }
 0x133   : > { %v246_v1 = vadd.f32 %v245_v0, %v244_v63 }
 0x135   : > { %v247_v2 = vrot.slane %v246_v1, 2 }
 0x137   : > { %v248_v3 = vadd.f32 %v247_v2, %v246_v1 }
 0x139   : > { %v249_v4 = vrot.slane %v248_v3, 1 }
 0x13b   : > { %v250_v5 = vadd.f32 %v249_v4, %v248_v3 }
 0x13d   : > { %331 = vpush %v250_v5 }
 0x16e   : > { %s332_s25 = spop %331 }
 0x16f   : > { %s252_s26 = ssub.f32 0.0, %s332_s25 }
 0x171   : > { %s253_s27 = sadd.f32 %s252_s26, %s236_s21 }
 0x173   : > { %255 = sst [smem:[#allocation2]] %s253_s27 }
 0x174   : > { %336 = dma.smem_to_hbm (%p340_p5), %s395_s28, 16, %s263_s24, [#allocation3]  }
 0x175   : > { %385 = dma.done.wait (%p340_p5), [#allocation3], 16  }
 0x176   : > { %387 = vsyncadd (%p340_p5), [#allocation3], 4294967280 }
 0x177   : > { %271 = sfence }
 0x178 PF: > { %s13_s9 = sadd.s32 1, %s390_s9  }
 0x179   : > { %p10_p6 = scmp.ge.s32.totalorder %s13_s9, 5  }
 0x17b   :  { %12 = sbr.rel (!%p10_p6) target bundleno = 1 (0x1), region = 64 }
 0x180   :  { %277 = vsyncpa [#allocation3], 1 }
 0x181   :  { %279 = vsyncpa [#allocation3 + $0x1], 1 }

</bundles_post_ra>
